<compile_context>
chip_gen: v5e
topology: v5e:2x2
jax: 0.10.0
libtpu: 0.0.40
codegen_flags: <defaults>
</compile_context>

<pallas_src>
import jax
import jax.numpy as jnp
from jax import lax
from jax.experimental import pallas as pl
from jax.experimental.pallas import tpu as pltpu


def crf_kernel(feats_ref, wt_ref, tpb_ref, out_ref):
    # feats_ref: (TN, H)  wt_ref: (K*K, H)  tpb_ref: (1, K*K)  out_ref: (TN, K*K)
    # scores[n, i*K + j] = sum_h feats[n, h] * W[j, h]   (MXU, f32 accumulation)
    scores = lax.dot_general(
        feats_ref[...], wt_ref[...],
        dimension_numbers=(((1,), (1,)), ((), ())),
        preferred_element_type=jnp.float32,
    )  # (TN, K*K) -- lane-dense directly from the MXU
    # out[n, i*K + j] = emission[n, j] + transition[i, j] + bias[j]
    out_ref[...] = scores + tpb_ref[...]


def _round_up(x, m):
    return -(-x // m) * m


def crf_forward(feats, weight, bias, transition):
    """feats: (B, T, H); weight: (K, H); bias: (K,); transition: (K, K)."""
    B, T, H = feats.shape
    K = weight.shape[0]
    KK = K * K
    N = B * T

    feats2d = feats.reshape(N, H).astype(jnp.float32)

    # Replicate the emission weight K times so the kernel's single matmul emits
    # the lane-dense (TN, K*K) slab directly: W_tiled[i*K + j, :] = W[j, :].
    w_tiled = jnp.tile(weight.astype(jnp.float32), (K, 1))            # (K*K, H)
    # Fold bias into the transition once (tiny K x K op), flattened row-major.
    tpb = (transition.astype(jnp.float32)
           + bias.astype(jnp.float32)[None, :]).reshape(1, KK)        # (1, K*K)

    # ---------------- Tile-size selection (per perf review) ----------------
    row_bytes = 4 * (H + KK)                    # f32 in + out HBM bytes per row
    params_bytes = 4 * (KK * H + KK)            # resident W_tiled + tpb

    # Per-generation VMEM budget for the double-buffered tiles + params.
    try:
        phys_vmem = pltpu.get_tpu_info().vmem_capacity_bytes
    except Exception:
        phys_vmem = 64 << 20                    # assume the smallest (v7x)
    vmem_budget = min((phys_vmem * 3) // 8, 48 << 20)  # ~24 MiB v7x, 48 MiB v5e/v6e

    if N <= 8:
        TN = N                                  # single full-extent block
    else:
        tn_target = max(512, (4 << 20) // row_bytes)         # ~4 MiB HBM / step
        tn_vmem = max(8, (vmem_budget - params_bytes) // (2 * row_bytes))
        tn_grid = max(8, _round_up(pl.cdiv(N, 4), 8))        # keep >= 4 grid steps
        TN = max(8, (min(tn_target, tn_vmem, tn_grid) // 8) * 8)

    # Ragged last block is fine: each out row depends only on its own input row,
    # so no pad of feats and no out[:N] slice is needed.
    grid = (pl.cdiv(N, TN),)

    tile_bytes = 2 * TN * row_bytes + params_bytes   # already double-buffered
    vmem_limit = int(min(max(tile_bytes * 5 // 4, 16 << 20), phys_vmem // 2))

    cost = pl.CostEstimate(
        flops=2 * N * H * KK + N * KK,
        transcendentals=0,
        bytes_accessed=N * H * 4 + KK * H * 4 + KK * 4 + N * KK * 4,
    )

    out = pl.pallas_call(
        crf_kernel,
        out_shape=jax.ShapeDtypeStruct((N, KK), jnp.float32),
        grid_spec=pl.GridSpec(
            grid=grid,
            in_specs=[
                pl.BlockSpec((TN, H), lambda i: (i, 0)),     # feats tile (pipelined)
                pl.BlockSpec((KK, H), lambda i: (0, 0)),     # tiled weight (resident)
                pl.BlockSpec((1, KK), lambda i: (0, 0)),     # transition + bias
            ],
            out_specs=pl.BlockSpec((TN, KK), lambda i: (i, 0)),
        ),
        compiler_params=pltpu.CompilerParams(
            dimension_semantics=("parallel",),
            vmem_limit_bytes=vmem_limit,
        ),
        cost_estimate=cost,
    )(feats2d, w_tiled, tpb)

    # Row-major view: row b*T + t, col i*K + j  ->  (B, T, K, K). Zero-cost.
    return out.reshape(B, T, K, K)


if __name__ == "__main__":
    B, T, H, K = 2, 8, 32, 8  # batch, timesteps, hidden_dim, tagset_size

    key = jax.random.PRNGKey(0)
    k_feats, k_w, k_b = jax.random.split(key, 3)

    feats = jax.random.normal(k_feats, (B, T, H), dtype=jnp.float32)
    # Deterministic "Linear" params (PyTorch-style small uniform init).
    bound = 1.0 / (H ** 0.5)
    weight = jax.random.uniform(k_w, (K, H), jnp.float32, -bound, bound)
    bias = jax.random.uniform(k_b, (K,), jnp.float32, -bound, bound)
    # Module zeroes the transition matrix in __init__ (transition.data.zero_()).
    transition = jnp.zeros((K, K), dtype=jnp.float32)

    out = crf_forward(feats, weight, bias, transition)
    out = jax.block_until_ready(out)

    # Pure-JAX reference check.
    emission_ref = feats @ weight.T + bias                          # (B, T, K)
    ref = emission_ref[:, :, None, :] + transition[None, None, :, :]
    assert out.shape == (B, T, K, K)
    assert jnp.allclose(out, ref, atol=1e-5, rtol=1e-5)

    print("KERNEL_OK")
</pallas_src>

<mosaic_0001>
module attributes {stable_mosaic.version = 11 : i64} {
  func.func @crf_kernel(%arg0: i32, %arg1: memref<8x32xf32, #tpu.memory_space<vmem>>, %arg2: memref<64x32xf32, #tpu.memory_space<vmem>>, %arg3: memref<1x64xf32, #tpu.memory_space<vmem>>, %arg4: memref<8x64xf32, #tpu.memory_space<vmem>>) attributes {dimension_semantics = [#tpu.dimension_semantics<parallel>], iteration_bounds = array<i64: 2>, scalar_prefetch = 0 : i64, scratch_operands = 0 : i64, tpu.core_type = #tpu.core_type<tc>, window_params = [{transform_indices = @transform_0, window_bounds = array<i64: 8, 32>}, {pipeline_mode = #tpu.pipeline_mode<synchronous>, transform_indices = @transform_1, window_bounds = array<i64: 64, 32>}, {pipeline_mode = #tpu.pipeline_mode<synchronous>, transform_indices = @transform_2, window_bounds = array<i64: 1, 64>}, {transform_indices = @transform_3, window_bounds = array<i64: 8, 64>}]} {
    %c0 = arith.constant 0 : index
    %c0_0 = arith.constant 0 : index
    %0 = vector.load %arg1[%c0, %c0_0] : memref<8x32xf32, #tpu.memory_space<vmem>>, vector<8x32xf32>
    %c0_1 = arith.constant 0 : index
    %c0_2 = arith.constant 0 : index
    %1 = vector.load %arg2[%c0_1, %c0_2] : memref<64x32xf32, #tpu.memory_space<vmem>>, vector<64x32xf32>
    %cst = arith.constant dense<0.000000e+00> : vector<8x64xf32>
    %2 = tpu.matmul %0, %1, %cst {dimension_numbers = #tpu.dot_dimension_numbers<[1], [1], [0], [0], [0, 0, 1, 0], [], []>} : vector<8x32xf32>, vector<64x32xf32>, vector<8x64xf32> -> vector<8x64xf32>
    %c0_3 = arith.constant 0 : index
    %c0_4 = arith.constant 0 : index
    %3 = vector.load %arg3[%c0_3, %c0_4] : memref<1x64xf32, #tpu.memory_space<vmem>>, vector<1x64xf32>
    %4 = vector.broadcast %3 : vector<1x64xf32> to vector<8x64xf32>
    %5 = arith.addf %2, %4 : vector<8x64xf32>
    %c0_5 = arith.constant 0 : index
    %c0_6 = arith.constant 0 : index
    %6 = vector.load %arg4[%c0_5, %c0_6] : memref<8x64xf32, #tpu.memory_space<vmem>>, vector<8x64xf32>
    tpu.vector_store %arg4[%c0_5, %c0_6], %5 {strides = array<i32>} : memref<8x64xf32, #tpu.memory_space<vmem>>, vector<8x64xf32>,
    return
  }
  func.func @transform_0(%arg0: i32) -> (i32, i32) {
    %c0_i32 = arith.constant 0 : i32
    %c0_i32_0 = arith.constant 0 : i32
    return %arg0, %c0_i32 : i32, i32
  }
  func.func @transform_1(%arg0: i32) -> (i32, i32) {
    %c0_i32 = arith.constant 0 : i32
    %c0_i32_0 = arith.constant 0 : i32
    %c0_i32_1 = arith.constant 0 : i32
    return %c0_i32, %c0_i32_0 : i32, i32
  }
  func.func @transform_2(%arg0: i32) -> (i32, i32) {
    %c0_i32 = arith.constant 0 : i32
    %c0_i32_0 = arith.constant 0 : i32
    %c0_i32_1 = arith.constant 0 : i32
    return %c0_i32, %c0_i32_0 : i32, i32
  }
  func.func @transform_3(%arg0: i32) -> (i32, i32) {
    %c0_i32 = arith.constant 0 : i32
    %c0_i32_0 = arith.constant 0 : i32
    return %arg0, %c0_i32 : i32, i32
  }
}

</mosaic_0001>

<bundles_post_ra>
// kernel: tpu_custom_call.1
= control target key start
LH: loop header
LB: loop body
LE: loop exit
PB: predicated region body
PF: predicated region fallthrough
CT: control target
= control target key end

     0   :  { %8 = vsyncpa [#allocation3], 0  ;;  %s568_s0 = inlined_call_operand.vmem [shape: f32[16,32], index: 0, kind: input, shape index: {}]   ;;  %s569_s1 = inlined_call_operand.vmem [shape: f32[64,32], index: 1, kind: input, shape index: {}]   ;;  %s570_s2 = inlined_call_operand.vmem [shape: f32[1,64], index: 2, kind: input, shape index: {}]   ;;  %s571_s3 = inlined_call_operand.hbm [shape: f32[16,64], index: 3, kind: output, shape index: {}]  }
   0x1   :  { %10 = vsyncpa [#allocation3 + $0x1], 0  ;;  %s447_s12 = smov 0   ;;  %s449_s13 = smov 0  }
   0x2   :  { %s451_s14 = smov 0   ;;  %s453_s15 = smov 0  }
   0x3 LB: > { %s468_s16 = sadd.s32 4294967295, %s425_s15   ;;  %s304_s17 = sadd.s32 4294967294, %s425_s15   ;;  %s425_s15 = sphi %s453_s15, %s577_s15   ;;  %s421_s14 = sphi %s451_s14, %s576_s14   ;;  %s417_s13 = sphi %s449_s13, %s575_s13   ;;  %s413_s12 = sphi %s447_s12, %s574_s12  }
   0x4   : > { %s472_s18 = sadd.s32 1, %s425_s15   ;;  %s91_s19 = sadd.s32 1, %s421_s14 }
   0x5   : > { %s88_s20 = ssub.s32 %s425_s15, %s472_s18  ;;  %p101_p0 = scmp.ne.s32.totalorder %s421_s14, %s417_s13 }
   0x6   : > { %p89_p1 = scmp.eq.s32.totalorder %s88_s20, 0  ;;  %p102_p2 = scmp.eq.s32.totalorder %s468_s16, 1 }
   0x7   : > { %p107_p3 = scmp.ne.s32.totalorder %s417_s13, %s413_s12  ;;  %p108_p4 = scmp.eq.s32.totalorder %s304_s17, 1 }
   0x8   : > { %s483_s21 = scalar_select %p89_p1, %s421_s14, %s91_s19  }
   0x9   : > { %p485_p5 = por %p102_p2, %p101_p0  ;;  %p489_p6 = por %p108_p4, %p107_p3 }
   0xa   : > { %p307_p7 = scmp.ge.s32.totalorder %s425_s15, 1  ;;  %p139_p8 = scmp.lt.s32.totalorder %s425_s15, 3 }
   0xc   : > { %p140_p9 = pnand %p307_p7, %p139_p8 }
   0xd   : > { %p162_p10 = scmp.lt.s32.totalorder (!%p140_p9), %s468_s16, 1  ;;  %s159_s27 = sand.u32 (!%p140_p9), 1, %s417_s13  }
   0xe   : > { %143 = sbr.rel (%p140_p9) target bundleno = 182 (0xb6), region = 32  ;;  %s308_s28 = sshll.u32 (!%p140_p9), %s159_s27, 3 }
   0xf   : > { %s320_s29 = sshll.u32 (!%p140_p9), %s468_s16, 3  ;;  %s161_s8 = scalar_lea.vmem (!%p140_p9), [#allocation2], %s308_s28 }
  0x10   : > { %s240_s5 = scalar_lea.hbm (!%p140_p9), %s571_s3, %s320_s29  ;;  %s230_s11 = scalar_lea.sflag (!%p140_p9), [#allocation3], %s159_s27 }
  0x11   : > { %s244_s10 = sshll.u32 (!%p140_p9), %s240_s5, 4  ;;  %s383_s24 = scalar_lea.hbm (!%p140_p9), %s571_s3, 16  ;;  %s245_s10 = int_to_ptr.hbm [resolvable:$true] %s244_s10 }
  0x13   : > { %v174_v0 = vld [vmem:[%s569_s1 + $0x38] sm:$0xff]  ;;  %vm179_vm0 = vcmask 261120   ;;  %v173_v1 = vld [vmem:[%s569_s1 + $0x30] sm:$0xff]  ;;  %v172_v2 = vld [vmem:[%s569_s1 + $0x28] sm:$0xff]  ;;  %s163_s9 = scalar_select %p162_p10, %s468_s16, 1  ;;  %vm227_vm1 = vcmask 523264  }
  0x14   : > { %310 = vmatpush.xpose.msk.msra.mxu0 %vm179_vm0, %v174_v0  ;;  %v171_v3 = vld [vmem:[%s569_s1 + $0x20] sm:$0xff]  ;;  %v170_v4 = vld [vmem:[%s569_s1 + $0x18] sm:$0xff]  ;;  %v169_v5 = vld [vmem:[%s569_s1 + $0x10] sm:$0xff]  ;;  %s377_s16 = sshra.s32 %s245_s10, 4  ;;  %s378_s16 = int_to_ptr.hbm [resolvable:$true] %s377_s16 }
  0x15   : > { %v168_v6 = vld [vmem:[%s569_s1 + $0x8] sm:$0xff]  ;;  %s309_s17 = sshll.u32 %s163_s9, 3  ;;  %v167_v7 = vld [vmem:[%s569_s1] sm:$0xff]  ;;  %s242_s9 = sshll.u32 %s161_s8, 4  ;;  %s243_s9 = int_to_ptr.vmem [resolvable:$true] %s242_s9 }
  0x16   : > { %s165_s26 = scalar_lea.vmem %s568_s0, %s309_s17  ;;  %v362_v9 = vld [vmem:[%s570_s2] ss:$0 sm:$0xff]  ;;  %s379_s17 = scalar_lea.hbm %s378_s16, 8 }
  0x17   : > { %v166_v8 = vld [vmem:[%s165_s26] sm:$0xff]  ;;  %p380_p11 = scmp.ne.s32.totalorder %s378_s16, %s379_s17  ;;  %p384_p0 = scmp.lt.s32.totalorder %s378_s16, %s571_s3 }
  0x18   : > { %311 = vmatpush.xpose.msk.msra.mxu0 %vm179_vm0, %v173_v1  ;;  %p385_p1 = scmp.lt.s32.totalorder %s383_s24, %s379_s17 }
  0x19   : > { %p381_p12 = pnand %p380_p11, %p485_p5 }
  0x1a   : > { %p386_p2 = por %p385_p1, %p384_p0 }
  0x1b   : > { %p382_p13 = pneg %p381_p12 }
  0x1c   : > { %312 = vmatpush.xpose.msk.msra.mxu0 %vm179_vm0, %v172_v2 }
  0x1d   : > { %p387_p3 = pnand %p386_p2, %p382_p13 }
  0x20   : > { %313 = vmatpush.xpose.msk.msra.mxu0 %vm179_vm0, %v171_v3 }
  0x24   : > { %314 = vmatpush.xpose.msk.msra.mxu0 %vm179_vm0, %v170_v4 }
  0x28   : > { %315 = vmatpush.xpose.msk.msra.mxu0 %vm179_vm0, %v169_v5 }
  0x2c   : > { %316 = vmatpush.xpose.msk.msra.mxu0 %vm179_vm0, %v168_v6 }
  0x30   : > { %317 = vmatpush.xpose.msk.msra.mxu0 %vm179_vm0, %v167_v7 }
  0x33   : > { %318 = vmatmul.msk.f32.vlgmr.msra.gmra.mxu0 %vm179_vm0, %v166_v8 }
  0xb0   : > { %v224_v10 = vpop.f32.mrf.mxu0 }
  0xb1   : > { %v225_v11 = vadd.f32 %v362_v9, %v224_v10 }
  0xb3   : > { %228 = vst.msk [vmem:[%s161_s8] sm:$0xff] %vm227_vm1, %v225_v11 }
  0xb4   : > { %390 = shalt.err (!%p387_p3)
}
  0xb5   : > { %323 = dma.vmem_to_hbm [thread:$0]  (%p485_p5), %s243_s9, 128, %s245_s10, %s230_s11  }
  0xb6 PF: > { %p329_p4 = scmp.ge.s32.totalorder %s425_s15, 2  ;;  %s256_s27 = sand.u32 1, %s413_s12  }
  0xb7   : > { %s257_s28 = scalar_lea.sflag [#allocation3], %s256_s27 }
  0xb8   : > { %p326_p7 = pnand %p329_p4, %p489_p6 }
  0xba   : > { %p327_p8 = pneg %p326_p7 }
  0xbc   : > { %408 = dma.done.wait (%p327_p8), %s257_s28, 128  }
  0xbd   : > { %410 = vsyncadd (%p327_p8), %s257_s28, 4294967168  ;;  %p13_p9 = scmp.ge.s32.totalorder %s472_s18, 4   ;;  %s574_s12 = smov %s417_s13 }
  0xbe   : > { %s575_s13 = smov %s421_s14  ;;  %s576_s14 = smov %s483_s21 }
  0xbf   : > { %s577_s15 = smov %s472_s18  ;;  %15 = sbr.rel (!%p13_p9) target bundleno = 3 (0x3), region = 67 }
  0xc4   :  { %263 = vsyncpa [#allocation3], 1 }
  0xc5   :  { %265 = vsyncpa [#allocation3 + $0x1], 1 }

</bundles_post_ra>
